<compile_context>
chip_gen: v6e
topology: v6e:2x2x1
jax: 0.10.0
libtpu: 0.0.40
codegen_flags: <defaults>
</compile_context>

<pallas_src>
import math

import jax
import jax.numpy as jnp
from jax.experimental import pallas as pl
from jax.experimental.pallas import tpu as pltpu

# ----------------------------- configuration --------------------------------
NUM_CLASSES = 3
EMBED       = 24          # embed_size
COND        = 8           # cond_size
D_MODEL     = EMBED + COND            # 32
HEADS       = 4
HEAD_DIM    = D_MODEL // HEADS        # 8
FWD_EXP     = 2
FF_HIDDEN   = FWD_EXP * EMBED         # 48
B           = 2
S           = 8
EPS         = 1e-5

# ------------------------- packed operand layouts ----------------------------
# Stacked projection columns: [ K (32) | Vtilde heads (4*32=128) | Q0..Q2 (96) ]
PROJ_COLS = D_MODEL * (1 + HEADS + NUM_CLASSES)   # 256
VT_OFF    = D_MODEL                               # 32
Q_OFF     = D_MODEL * (1 + HEADS)                 # 160

# Weight slab (rows = input dim, 128-lane-aligned column starts).
W1_OFF  = 256
W2_OFF  = 384
W_COLS  = W2_OFF + EMBED                          # 408
W_ROWS  = FF_HIDDEN                               # 48

# Bias slab: one row per vector, lane offset 0.
B_COLS = 256
R_BP, R_G1, R_BETA1, R_BO, R_B1, R_B2, R_G2, R_BETA2 = range(8)


# ------------------------------- kernel --------------------------------------
def _fused_block_kernel(act_ref, w_ref, b_ref, o_ref):
    """Whole TransformerBlock forward for one batch element (grid step)."""
    act = act_ref[0]                      # (S, D_MODEL): [x | conditioning]
    x = act[:, :EMBED]                    # (S, EMBED)
    c = act[:, EMBED:]                    # (S, COND)

    # ---- unpack bias / affine rows ------------------------------------------
    bp    = b_ref[R_BP:R_BP + 1, :]                 # (1, 256)
    g1    = b_ref[R_G1:R_G1 + 1, :EMBED]
    beta1 = b_ref[R_BETA1:R_BETA1 + 1, :EMBED]
    bo    = b_ref[R_BO:R_BO + 1, :D_MODEL]
    b1    = b_ref[R_B1:R_B1 + 1, :FF_HIDDEN]
    b2    = b_ref[R_B2:R_B2 + 1, :EMBED]
    g2    = b_ref[R_G2:R_G2 + 1, :EMBED]
    beta2 = b_ref[R_BETA2:R_BETA2 + 1, :EMBED]

    # ---- LayerNorm1 (dropout = identity, eval semantics) ---------------------
    mu = jnp.mean(x, axis=-1, keepdims=True)
    xc0 = x - mu
    var = jnp.mean(xc0 * xc0, axis=-1, keepdims=True)
    xn = xc0 * jax.lax.rsqrt(var + EPS) * g1 + beta1            # (S, EMBED)

    xcond = jnp.concatenate([xn, c], axis=-1)                   # (S, D_MODEL)

    # ---- single stacked projection: [K | Vtilde_heads | Q_classes] ----------
    wp = w_ref[:D_MODEL, :PROJ_COLS]                            # (32, 256)
    proj = jnp.dot(xcond, wp, preferred_element_type=jnp.float32) + bp  # (S,256)

    k  = proj[:, :D_MODEL]                                      # (S, 32)
    vt = proj[:, VT_OFF:VT_OFF + HEADS * D_MODEL]               # (S, 128)

    # class-dependent query: q = sum_i cond[..., i] * Q_i  (no zeros init)
    cw = c[:, :NUM_CLASSES]                                     # (S, 3)
    q = sum(cw[:, i:i + 1] * proj[:, Q_OFF + i * D_MODEL:Q_OFF + (i + 1) * D_MODEL]
            for i in range(NUM_CLASSES))                        # (S, 32)

    # ---- multi-head attention: head-major stacks, fused softmax --------------
    qh  = jnp.stack([q[:, h * HEAD_DIM:(h + 1) * HEAD_DIM] for h in range(HEADS)],
                    axis=0)                                     # (H, S, HEAD_DIM)
    kh  = jnp.stack([k[:, h * HEAD_DIM:(h + 1) * HEAD_DIM] for h in range(HEADS)],
                    axis=0)                                     # (H, S, HEAD_DIM)
    vth = jnp.stack([vt[:, h * D_MODEL:(h + 1) * D_MODEL] for h in range(HEADS)],
                    axis=0)                                     # (H, S, D_MODEL)

    scale = 1.0 / math.sqrt(HEAD_DIM)
    sc = jnp.einsum("hqd,hkd->hqk", qh, kh,
                    preferred_element_type=jnp.float32) * scale  # (H, S, S)
    sc = sc - jnp.max(sc, axis=-1, keepdims=True)
    p = jnp.exp(sc)
    p = p / jnp.sum(p, axis=-1, keepdims=True)                   # exact normalize
    ctx = jnp.einsum("hqk,hkd->hqd", p, vth,
                     preferred_element_type=jnp.float32)         # (H, S, D_MODEL)
    attn = jnp.sum(ctx, axis=0) + bo                             # (S, D_MODEL); W_o folded

    # ---- residual (first EMBED channels only, as in the reference) ----------
    x1 = xn + attn[:, :EMBED]                                    # (S, EMBED)

    # ---- feed-forward ---------------------------------------------------------
    w1 = w_ref[:EMBED, W1_OFF:W1_OFF + FF_HIDDEN]                # (24, 48)
    w2 = w_ref[:FF_HIDDEN, W2_OFF:W2_OFF + EMBED]                # (48, 24)
    h1 = jnp.maximum(
        jnp.dot(x1, w1, preferred_element_type=jnp.float32) + b1, 0.0)
    ff = jnp.dot(h1, w2, preferred_element_type=jnp.float32) + b2

    # ---- LayerNorm2(x1 + ff) --------------------------------------------------
    y = x1 + ff
    mu2 = jnp.mean(y, axis=-1, keepdims=True)
    yc = y - mu2
    var2 = jnp.mean(yc * yc, axis=-1, keepdims=True)
    out = yc * jax.lax.rsqrt(var2 + EPS) * g2 + beta2
    o_ref[...] = out.reshape(1, S, EMBED)


# ------------------------------ wrapper ---------------------------------------
@jax.jit
def transformer_block_pallas(x, conditioning, fp):
    """One pallas_call, grid over the batch dim; weights stay VMEM-resident."""
    act = jnp.concatenate([x, conditioning], axis=-1)     # (B, S, D_MODEL)
    return pl.pallas_call(
        _fused_block_kernel,
        out_shape=jax.ShapeDtypeStruct((B, S, EMBED), jnp.float32),
        grid=(B,),
        in_specs=[
            pl.BlockSpec((1, S, D_MODEL), lambda b: (b, 0, 0)),   # per-step activations
            pl.BlockSpec((W_ROWS, W_COLS), lambda b: (0, 0)),     # weights: resident
            pl.BlockSpec((8, B_COLS), lambda b: (0, 0)),          # biases:  resident
        ],
        out_specs=pl.BlockSpec((1, S, EMBED), lambda b: (b, 0, 0)),
        compiler_params=pltpu.CompilerParams(
            dimension_semantics=("parallel",)),                   # 2nd TC on v7x
    )(act, fp["w"], fp["b"])


def fuse_params(p):
    """One-time host-side prep: fold W_o into V, stack K/Vtilde/Q0..Q2 into one
    projection weight, and pack everything into one weight slab + one bias slab."""
    wv, bv, wo = p["wv"], p["bv"], p["wo"]
    # Fold W_o per head: Vtilde_h = x @ (Wv[:,h] @ Wo[h,:]) + bv[:,h] @ Wo[h,:]
    wvt = jnp.concatenate(
        [wv[:, h * HEAD_DIM:(h + 1) * HEAD_DIM] @ wo[h * HEAD_DIM:(h + 1) * HEAD_DIM, :]
         for h in range(HEADS)], axis=1)                              # (32, 128)
    bvt = jnp.concatenate(
        [bv[:, h * HEAD_DIM:(h + 1) * HEAD_DIM] @ wo[h * HEAD_DIM:(h + 1) * HEAD_DIM, :]
         for h in range(HEADS)], axis=1)                              # (1, 128)

    wp = jnp.concatenate([p["wk"], wvt] + [p["wq"][i] for i in range(NUM_CLASSES)],
                         axis=1)                                      # (32, 256)
    bp = jnp.concatenate([p["bk"], bvt] + [p["bq"][i:i + 1] for i in range(NUM_CLASSES)],
                         axis=1)                                      # (1, 256)

    w_slab = jnp.zeros((W_ROWS, W_COLS), jnp.float32)
    w_slab = w_slab.at[:D_MODEL, :PROJ_COLS].set(wp)
    w_slab = w_slab.at[:EMBED, W1_OFF:W1_OFF + FF_HIDDEN].set(p["w1"])
    w_slab = w_slab.at[:FF_HIDDEN, W2_OFF:W2_OFF + EMBED].set(p["w2"])

    b_slab = jnp.zeros((8, B_COLS), jnp.float32)
    b_slab = b_slab.at[R_BP, :PROJ_COLS].set(bp[0])
    b_slab = b_slab.at[R_G1, :EMBED].set(p["g1"][0])
    b_slab = b_slab.at[R_BETA1, :EMBED].set(p["beta1"][0])
    b_slab = b_slab.at[R_BO, :D_MODEL].set(p["bo"][0])
    b_slab = b_slab.at[R_B1, :FF_HIDDEN].set(p["b1"][0])
    b_slab = b_slab.at[R_B2, :EMBED].set(p["b2"][0])
    b_slab = b_slab.at[R_G2, :EMBED].set(p["g2"][0])
    b_slab = b_slab.at[R_BETA2, :EMBED].set(p["beta2"][0])
    return {"w": w_slab, "b": b_slab}


# --------------------------- pure-JAX reference -------------------------------
def reference_forward(x, cond, p):
    def ln(z, g, b):
        mu = jnp.mean(z, -1, keepdims=True)
        var = jnp.mean((z - mu) ** 2, -1, keepdims=True)
        return (z - mu) / jnp.sqrt(var + EPS) * g + b

    xn = ln(x, p["g1"], p["beta1"])
    xc = jnp.concatenate([xn, cond], -1)
    k = xc @ p["wk"] + p["bk"]
    v = xc @ p["wv"] + p["bv"]
    cw = cond[..., :NUM_CLASSES]
    q = jnp.zeros_like(k)
    for i in range(NUM_CLASSES):
        qi = xc @ p["wq"][i] + p["bq"][i]
        q = q + cw[..., i:i + 1] * qi

    def heads(t):
        return t.reshape(B, S, HEADS, HEAD_DIM).transpose(0, 2, 1, 3)

    qh, kh, vh = heads(q), heads(k), heads(v)
    scores = jnp.einsum("bhqd,bhkd->bhqk", qh, kh) / math.sqrt(HEAD_DIM)
    pm = jax.nn.softmax(scores, -1)
    o = jnp.einsum("bhqk,bhkd->bhqd", pm, vh)
    o = o.transpose(0, 2, 1, 3).reshape(B, S, D_MODEL)
    attn = o @ p["wo"] + p["bo"]
    x1 = xn + attn[..., :EMBED]
    h1 = jax.nn.relu(x1 @ p["w1"] + p["b1"])
    ff = h1 @ p["w2"] + p["b2"]
    return ln(x1 + ff, p["g2"], p["beta2"])


# --------------------------------- main ---------------------------------------
def make_params(key):
    ks = jax.random.split(key, 20)
    n = lambda k, shp, s=0.1: (s * jax.random.normal(k, shp)).astype(jnp.float32)
    return {
        "g1":    1.0 + n(ks[0], (1, EMBED)),
        "beta1": n(ks[1], (1, EMBED)),
        "wk": n(ks[2], (D_MODEL, D_MODEL)), "bk": n(ks[3], (1, D_MODEL)),
        "wv": n(ks[4], (D_MODEL, D_MODEL)), "bv": n(ks[5], (1, D_MODEL)),
        "wq": n(ks[6], (NUM_CLASSES, D_MODEL, D_MODEL)),
        "bq": n(ks[7], (NUM_CLASSES, D_MODEL)),
        "wo": n(ks[8], (D_MODEL, D_MODEL)), "bo": n(ks[9], (1, D_MODEL)),
        "w1": n(ks[10], (EMBED, FF_HIDDEN)), "b1": n(ks[11], (1, FF_HIDDEN)),
        "w2": n(ks[12], (FF_HIDDEN, EMBED)), "b2": n(ks[13], (1, EMBED)),
        "g2":    1.0 + n(ks[14], (1, EMBED)),
        "beta2": n(ks[15], (1, EMBED)),
    }


if __name__ == "__main__":
    key = jax.random.PRNGKey(0)
    kp, kx, kc = jax.random.split(key, 3)
    params = make_params(kp)
    fparams = fuse_params(params)
    x = jax.random.normal(kx, (B, S, EMBED), jnp.float32)
    conditioning = jax.random.normal(kc, (B, S, COND), jnp.float32)

    out = jax.block_until_ready(transformer_block_pallas(x, conditioning, fparams))

    # Reference at true f32 matmul precision (exact softmax in the kernel now,
    # so the only remaining deltas are matmul-associativity-level, ~1e-6).
    with jax.default_matmul_precision("highest"):
        ref = jax.block_until_ready(reference_forward(x, conditioning, params))

    max_diff = float(jnp.max(jnp.abs(out - ref)))
    assert out.shape == (B, S, EMBED)
    assert max_diff < 2e-3, f"mismatch vs reference: {max_diff}"
    print("KERNEL_OK")
</pallas_src>

<mosaic_0001>
module attributes {stable_mosaic.version = 11 : i64} {
  func.func @_fused_block_kernel(%arg0: i32, %arg1: memref<1x8x32xf32, #tpu.memory_space<vmem>>, %arg2: memref<48x408xf32, #tpu.memory_space<vmem>>, %arg3: memref<8x256xf32, #tpu.memory_space<vmem>>, %arg4: memref<1x8x24xf32, #tpu.memory_space<vmem>>) attributes {dimension_semantics = [#tpu.dimension_semantics<parallel>], iteration_bounds = array<i64: 2>, scalar_prefetch = 0 : i64, scratch_operands = 0 : i64, tpu.core_type = #tpu.core_type<tc>, window_params = [{transform_indices = @transform_0, window_bounds = array<i64: 1, 8, 32>}, {pipeline_mode = #tpu.pipeline_mode<synchronous>, transform_indices = @transform_1, window_bounds = array<i64: 48, 408>}, {pipeline_mode = #tpu.pipeline_mode<synchronous>, transform_indices = @transform_2, window_bounds = array<i64: 8, 256>}, {transform_indices = @transform_3, window_bounds = array<i64: 1, 8, 24>}]} {
    %c0 = arith.constant 0 : index
    %c0_0 = arith.constant 0 : index
    %c0_1 = arith.constant 0 : index
    %0 = vector.load %arg1[%c0, %c0_0, %c0_1] : memref<1x8x32xf32, #tpu.memory_space<vmem>>, vector<1x8x32xf32>
    %1 = vector.shape_cast %0 : vector<1x8x32xf32> to vector<8x32xf32>
    %2 = vector.extract_strided_slice %1 {offsets = [0, 0], sizes = [8, 24], strides = [1, 1]} : vector<8x32xf32> to vector<8x24xf32>
    %3 = vector.extract_strided_slice %1 {offsets = [0, 24], sizes = [8, 8], strides = [1, 1]} : vector<8x32xf32> to vector<8x8xf32>
    %c0_2 = arith.constant 0 : index
    %c0_3 = arith.constant 0 : index
    %4 = vector.load %arg3[%c0_2, %c0_3] : memref<8x256xf32, #tpu.memory_space<vmem>>, vector<1x256xf32>
    %c1 = arith.constant 1 : index
    %c0_4 = arith.constant 0 : index
    %5 = vector.load %arg3[%c1, %c0_4] : memref<8x256xf32, #tpu.memory_space<vmem>>, vector<1x24xf32>
    %c2 = arith.constant 2 : index
    %c0_5 = arith.constant 0 : index
    %6 = vector.load %arg3[%c2, %c0_5] : memref<8x256xf32, #tpu.memory_space<vmem>>, vector<1x24xf32>
    %c3 = arith.constant 3 : index
    %c0_6 = arith.constant 0 : index
    %7 = vector.load %arg3[%c3, %c0_6] : memref<8x256xf32, #tpu.memory_space<vmem>>, vector<1x32xf32>
    %c4 = arith.constant 4 : index
    %c0_7 = arith.constant 0 : index
    %8 = vector.load %arg3[%c4, %c0_7] : memref<8x256xf32, #tpu.memory_space<vmem>>, vector<1x48xf32>
    %c5 = arith.constant 5 : index
    %c0_8 = arith.constant 0 : index
    %9 = vector.load %arg3[%c5, %c0_8] : memref<8x256xf32, #tpu.memory_space<vmem>>, vector<1x24xf32>
    %c6 = arith.constant 6 : index
    %c0_9 = arith.constant 0 : index
    %10 = vector.load %arg3[%c6, %c0_9] : memref<8x256xf32, #tpu.memory_space<vmem>>, vector<1x24xf32>
    %c7 = arith.constant 7 : index
    %c0_10 = arith.constant 0 : index
    %11 = vector.load %arg3[%c7, %c0_10] : memref<8x256xf32, #tpu.memory_space<vmem>>, vector<1x24xf32>
    %cst = arith.constant dense<0.000000e+00> : vector<8xf32>
    %12 = vector.multi_reduction <add>, %2, %cst [1] : vector<8x24xf32> to vector<8xf32>
    %13 = vector.shape_cast %12 : vector<8xf32> to vector<8x1xf32>
    %cst_11 = arith.constant 2.400000e+01 : f32
    %14 = vector.broadcast %cst_11 : f32 to vector<8x1xf32>
    %15 = arith.divf %13, %14 : vector<8x1xf32>
    %16 = vector.broadcast %15 : vector<8x1xf32> to vector<8x24xf32>
    %17 = arith.subf %2, %16 : vector<8x24xf32>
    %18 = arith.mulf %17, %17 : vector<8x24xf32>
    %cst_12 = arith.constant dense<0.000000e+00> : vector<8xf32>
    %19 = vector.multi_reduction <add>, %18, %cst_12 [1] : vector<8x24xf32> to vector<8xf32>
    %20 = vector.shape_cast %19 : vector<8xf32> to vector<8x1xf32>
    %cst_13 = arith.constant 2.400000e+01 : f32
    %21 = vector.broadcast %cst_13 : f32 to vector<8x1xf32>
    %22 = arith.divf %20, %21 : vector<8x1xf32>
    %cst_14 = arith.constant 9.99999974E-6 : f32
    %23 = vector.broadcast %cst_14 : f32 to vector<8x1xf32>
    %24 = arith.addf %22, %23 : vector<8x1xf32>
    %25 = math.rsqrt %24 : vector<8x1xf32>
    %26 = vector.broadcast %25 : vector<8x1xf32> to vector<8x24xf32>
    %27 = arith.mulf %17, %26 : vector<8x24xf32>
    %28 = vector.broadcast %5 : vector<1x24xf32> to vector<8x24xf32>
    %29 = arith.mulf %27, %28 : vector<8x24xf32>
    %30 = vector.broadcast %6 : vector<1x24xf32> to vector<8x24xf32>
    %31 = arith.addf %29, %30 : vector<8x24xf32>
    %32 = tpu.concatenate %31, %3 in 1 : vector<8x24xf32>, vector<8x8xf32> -> vector<8x32xf32>
    %c0_15 = arith.constant 0 : index
    %c0_16 = arith.constant 0 : index
    %33 = vector.load %arg2[%c0_15, %c0_16] : memref<48x408xf32, #tpu.memory_space<vmem>>, vector<32x256xf32>
    %cst_17 = arith.constant dense<0.000000e+00> : vector<8x256xf32>
    %34 = tpu.matmul %32, %33, %cst_17 {dimension_numbers = #tpu.dot_dimension_numbers<[1], [0], [0], [1], [0, 0, 1, 1], [], []>} : vector<8x32xf32>, vector<32x256xf32>, vector<8x256xf32> -> vector<8x256xf32>
    %35 = vector.broadcast %4 : vector<1x256xf32> to vector<8x256xf32>
    %36 = arith.addf %34, %35 : vector<8x256xf32>
    %37 = vector.extract_strided_slice %36 {offsets = [0, 0], sizes = [8, 32], strides = [1, 1]} : vector<8x256xf32> to vector<8x32xf32>
    %38 = vector.extract_strided_slice %36 {offsets = [0, 32], sizes = [8, 128], strides = [1, 1]} : vector<8x256xf32> to vector<8x128xf32>
    %39 = vector.extract_strided_slice %3 {offsets = [0, 0], sizes = [8, 3], strides = [1, 1]} : vector<8x8xf32> to vector<8x3xf32>
    %40 = vector.extract_strided_slice %39 {offsets = [0, 0], sizes = [8, 1], strides = [1, 1]} : vector<8x3xf32> to vector<8x1xf32>
    %41 = vector.extract_strided_slice %36 {offsets = [0, 160], sizes = [8, 32], strides = [1, 1]} : vector<8x256xf32> to vector<8x32xf32>
    %42 = vector.broadcast %40 : vector<8x1xf32> to vector<8x32xf32>
    %43 = arith.mulf %42, %41 : vector<8x32xf32>
    %cst_18 = arith.constant 0.000000e+00 : f32
    %44 = vector.broadcast %cst_18 : f32 to vector<8x32xf32>
    %45 = arith.addf %44, %43 : vector<8x32xf32>
    %46 = vector.extract_strided_slice %39 {offsets = [0, 1], sizes = [8, 1], strides = [1, 1]} : vector<8x3xf32> to vector<8x1xf32>
    %47 = vector.extract_strided_slice %36 {offsets = [0, 192], sizes = [8, 32], strides = [1, 1]} : vector<8x256xf32> to vector<8x32xf32>
    %48 = vector.broadcast %46 : vector<8x1xf32> to vector<8x32xf32>
    %49 = arith.mulf %48, %47 : vector<8x32xf32>
    %50 = arith.addf %45, %49 : vector<8x32xf32>
    %51 = vector.extract_strided_slice %39 {offsets = [0, 2], sizes = [8, 1], strides = [1, 1]} : vector<8x3xf32> to vector<8x1xf32>
    %52 = vector.extract_strided_slice %36 {offsets = [0, 224], sizes = [8, 32], strides = [1, 1]} : vector<8x256xf32> to vector<8x32xf32>
    %53 = vector.broadcast %51 : vector<8x1xf32> to vector<8x32xf32>
    %54 = arith.mulf %53, %52 : vector<8x32xf32>
    %55 = arith.addf %50, %54 : vector<8x32xf32>
    %56 = vector.extract_strided_slice %55 {offsets = [0, 0], sizes = [8, 8], strides = [1, 1]} : vector<8x32xf32> to vector<8x8xf32>
    %57 = vector.extract_strided_slice %55 {offsets = [0, 8], sizes = [8, 8], strides = [1, 1]} : vector<8x32xf32> to vector<8x8xf32>
    %58 = vector.extract_strided_slice %55 {offsets = [0, 16], sizes = [8, 8], strides = [1, 1]} : vector<8x32xf32> to vector<8x8xf32>
    %59 = vector.extract_strided_slice %55 {offsets = [0, 24], sizes = [8, 8], strides = [1, 1]} : vector<8x32xf32> to vector<8x8xf32>
    %60 = vector.shape_cast %56 : vector<8x8xf32> to vector<1x8x8xf32>
    %61 = vector.shape_cast %57 : vector<8x8xf32> to vector<1x8x8xf32>
    %62 = vector.shape_cast %58 : vector<8x8xf32> to vector<1x8x8xf32>
    %63 = vector.shape_cast %59 : vector<8x8xf32> to vector<1x8x8xf32>
    %64 = tpu.concatenate %60, %61, %62, %63 in 0 : vector<1x8x8xf32>, vector<1x8x8xf32>, vector<1x8x8xf32>, vector<1x8x8xf32> -> vector<4x8x8xf32>
    %65 = vector.extract_strided_slice %37 {offsets = [0, 0], sizes = [8, 8], strides = [1, 1]} : vector<8x32xf32> to vector<8x8xf32>
    %66 = vector.extract_strided_slice %37 {offsets = [0, 8], sizes = [8, 8], strides = [1, 1]} : vector<8x32xf32> to vector<8x8xf32>
    %67 = vector.extract_strided_slice %37 {offsets = [0, 16], sizes = [8, 8], strides = [1, 1]} : vector<8x32xf32> to vector<8x8xf32>
    %68 = vector.extract_strided_slice %37 {offsets = [0, 24], sizes = [8, 8], strides = [1, 1]} : vector<8x32xf32> to vector<8x8xf32>
    %69 = vector.shape_cast %65 : vector<8x8xf32> to vector<1x8x8xf32>
    %70 = vector.shape_cast %66 : vector<8x8xf32> to vector<1x8x8xf32>
    %71 = vector.shape_cast %67 : vector<8x8xf32> to vector<1x8x8xf32>
    %72 = vector.shape_cast %68 : vector<8x8xf32> to vector<1x8x8xf32>
    %73 = tpu.concatenate %69, %70, %71, %72 in 0 : vector<1x8x8xf32>, vector<1x8x8xf32>, vector<1x8x8xf32>, vector<1x8x8xf32> -> vector<4x8x8xf32>
    %74 = vector.extract_strided_slice %38 {offsets = [0, 0], sizes = [8, 32], strides = [1, 1]} : vector<8x128xf32> to vector<8x32xf32>
    %75 = vector.extract_strided_slice %38 {offsets = [0, 32], sizes = [8, 32], strides = [1, 1]} : vector<8x128xf32> to vector<8x32xf32>
    %76 = vector.extract_strided_slice %38 {offsets = [0, 64], sizes = [8, 32], strides = [1, 1]} : vector<8x128xf32> to vector<8x32xf32>
    %77 = vector.extract_strided_slice %38 {offsets = [0, 96], sizes = [8, 32], strides = [1, 1]} : vector<8x128xf32> to vector<8x32xf32>
    %78 = vector.shape_cast %74 : vector<8x32xf32> to vector<1x8x32xf32>
    %79 = vector.shape_cast %75 : vector<8x32xf32> to vector<1x8x32xf32>
    %80 = vector.shape_cast %76 : vector<8x32xf32> to vector<1x8x32xf32>
    %81 = vector.shape_cast %77 : vector<8x32xf32> to vector<1x8x32xf32>
    %82 = tpu.concatenate %78, %79, %80, %81 in 0 : vector<1x8x32xf32>, vector<1x8x32xf32>, vector<1x8x32xf32>, vector<1x8x32xf32> -> vector<4x8x32xf32>
    "tpu.trace_start"() <{level = 10 : i32, message = "hqd,hkd->hqk"}> : () -> ()
    %cst_19 = arith.constant dense<0.000000e+00> : vector<4x8x8xf32>
    %83 = tpu.matmul %64, %73, %cst_19 {dimension_numbers = #tpu.dot_dimension_numbers<[2], [2], [1], [1], [0, 0, 0, 1, 1, 1], [0], [0]>} : vector<4x8x8xf32>, vector<4x8x8xf32>, vector<4x8x8xf32> -> vector<4x8x8xf32>
    "tpu.trace_stop"() : () -> ()
    %cst_20 = arith.constant 0.353553385 : f32
    %84 = vector.broadcast %cst_20 : f32 to vector<4x8x8xf32>
    %85 = arith.mulf %83, %84 : vector<4x8x8xf32>
    %cst_21 = arith.constant dense<0xFF800000> : vector<4x8xf32>
    %86 = vector.multi_reduction <maximumf>, %85, %cst_21 [2] : vector<4x8x8xf32> to vector<4x8xf32>
    %87 = vector.shape_cast %86 : vector<4x8xf32> to vector<4x8x1xf32>
    %88 = vector.broadcast %87 : vector<4x8x1xf32> to vector<4x8x8xf32>
    %89 = arith.subf %85, %88 : vector<4x8x8xf32>
    %90 = math.exp %89 : vector<4x8x8xf32>
    %cst_22 = arith.constant dense<0.000000e+00> : vector<4x8xf32>
    %91 = vector.multi_reduction <add>, %90, %cst_22 [2] : vector<4x8x8xf32> to vector<4x8xf32>
    %92 = vector.shape_cast %91 : vector<4x8xf32> to vector<4x8x1xf32>
    %93 = vector.broadcast %92 : vector<4x8x1xf32> to vector<4x8x8xf32>
    %94 = arith.divf %90, %93 : vector<4x8x8xf32>
    "tpu.trace_start"() <{level = 10 : i32, message = "hqk,hkd->hqd"}> : () -> ()
    %cst_23 = arith.constant dense<0.000000e+00> : vector<4x8x32xf32>
    %95 = tpu.matmul %94, %82, %cst_23 {dimension_numbers = #tpu.dot_dimension_numbers<[2], [1], [1], [2], [0, 0, 0, 1, 1, 2], [0], [0]>} : vector<4x8x8xf32>, vector<4x8x32xf32>, vector<4x8x32xf32> -> vector<4x8x32xf32>
    "tpu.trace_stop"() : () -> ()
    %cst_24 = arith.constant dense<0.000000e+00> : vector<8x32xf32>
    %96 = vector.multi_reduction <add>, %95, %cst_24 [0] : vector<4x8x32xf32> to vector<8x32xf32>
    %97 = vector.broadcast %7 : vector<1x32xf32> to vector<8x32xf32>
    %98 = arith.addf %96, %97 : vector<8x32xf32>
    %99 = vector.extract_strided_slice %98 {offsets = [0, 0], sizes = [8, 24], strides = [1, 1]} : vector<8x32xf32> to vector<8x24xf32>
    %100 = arith.addf %31, %99 : vector<8x24xf32>
    %c0_25 = arith.constant 0 : index
    %c256 = arith.constant 256 : index
    %101 = vector.load %arg2[%c0_25, %c256] : memref<48x408xf32, #tpu.memory_space<vmem>>, vector<24x48xf32>
    %c0_26 = arith.constant 0 : index
    %c384 = arith.constant 384 : index
    %102 = vector.load %arg2[%c0_26, %c384] : memref<48x408xf32, #tpu.memory_space<vmem>>, vector<48x24xf32>
    %cst_27 = arith.constant dense<0.000000e+00> : vector<8x48xf32>
    %103 = tpu.matmul %100, %101, %cst_27 {dimension_numbers = #tpu.dot_dimension_numbers<[1], [0], [0], [1], [0, 0, 1, 1], [], []>} : vector<8x24xf32>, vector<24x48xf32>, vector<8x48xf32> -> vector<8x48xf32>
    %104 = vector.broadcast %8 : vector<1x48xf32> to vector<8x48xf32>
    %105 = arith.addf %103, %104 : vector<8x48xf32>
    %cst_28 = arith.constant 0.000000e+00 : f32
    %106 = vector.broadcast %cst_28 : f32 to vector<8x48xf32>
    %107 = arith.maximumf %105, %106 : vector<8x48xf32>
    %cst_29 = arith.constant dense<0.000000e+00> : vector<8x24xf32>
    %108 = tpu.matmul %107, %102, %cst_29 {dimension_numbers = #tpu.dot_dimension_numbers<[1], [0], [0], [1], [0, 0, 1, 1], [], []>} : vector<8x48xf32>, vector<48x24xf32>, vector<8x24xf32> -> vector<8x24xf32>
    %109 = vector.broadcast %9 : vector<1x24xf32> to vector<8x24xf32>
    %110 = arith.addf %108, %109 : vector<8x24xf32>
    %111 = arith.addf %100, %110 : vector<8x24xf32>
    %cst_30 = arith.constant dense<0.000000e+00> : vector<8xf32>
    %112 = vector.multi_reduction <add>, %111, %cst_30 [1] : vector<8x24xf32> to vector<8xf32>
    %113 = vector.shape_cast %112 : vector<8xf32> to vector<8x1xf32>
    %cst_31 = arith.constant 2.400000e+01 : f32
    %114 = vector.broadcast %cst_31 : f32 to vector<8x1xf32>
    %115 = arith.divf %113, %114 : vector<8x1xf32>
    %116 = vector.broadcast %115 : vector<8x1xf32> to vector<8x24xf32>
    %117 = arith.subf %111, %116 : vector<8x24xf32>
    %118 = arith.mulf %117, %117 : vector<8x24xf32>
    %cst_32 = arith.constant dense<0.000000e+00> : vector<8xf32>
    %119 = vector.multi_reduction <add>, %118, %cst_32 [1] : vector<8x24xf32> to vector<8xf32>
    %120 = vector.shape_cast %119 : vector<8xf32> to vector<8x1xf32>
    %cst_33 = arith.constant 2.400000e+01 : f32
    %121 = vector.broadcast %cst_33 : f32 to vector<8x1xf32>
    %122 = arith.divf %120, %121 : vector<8x1xf32>
    %cst_34 = arith.constant 9.99999974E-6 : f32
    %123 = vector.broadcast %cst_34 : f32 to vector<8x1xf32>
    %124 = arith.addf %122, %123 : vector<8x1xf32>
    %125 = math.rsqrt %124 : vector<8x1xf32>
    %126 = vector.broadcast %125 : vector<8x1xf32> to vector<8x24xf32>
    %127 = arith.mulf %117, %126 : vector<8x24xf32>
    %128 = vector.broadcast %10 : vector<1x24xf32> to vector<8x24xf32>
    %129 = arith.mulf %127, %128 : vector<8x24xf32>
    %130 = vector.broadcast %11 : vector<1x24xf32> to vector<8x24xf32>
    %131 = arith.addf %129, %130 : vector<8x24xf32>
    %132 = vector.shape_cast %131 : vector<8x24xf32> to vector<1x8x24xf32>
    %c0_35 = arith.constant 0 : index
    %c0_36 = arith.constant 0 : index
    %c0_37 = arith.constant 0 : index
    %133 = vector.load %arg4[%c0_35, %c0_36, %c0_37] : memref<1x8x24xf32, #tpu.memory_space<vmem>>, vector<1x8x24xf32>
    tpu.vector_store %arg4[%c0_35, %c0_36, %c0_37], %132 {strides = array<i32>} : memref<1x8x24xf32, #tpu.memory_space<vmem>>, vector<1x8x24xf32>,
    return
  }
  func.func @transform_0(%arg0: i32) -> (i32, i32, i32) {
    %c0_i32 = arith.constant 0 : i32
    %c0_i32_0 = arith.constant 0 : i32
    %c0_i32_1 = arith.constant 0 : i32
    return %arg0, %c0_i32, %c0_i32_0 : i32, i32, i32
  }
  func.func @transform_1(%arg0: i32) -> (i32, i32) {
    %c0_i32 = arith.constant 0 : i32
    %c0_i32_0 = arith.constant 0 : i32
    %c0_i32_1 = arith.constant 0 : i32
    return %c0_i32, %c0_i32_0 : i32, i32
  }
  func.func @transform_2(%arg0: i32) -> (i32, i32) {
    %c0_i32 = arith.constant 0 : i32
    %c0_i32_0 = arith.constant 0 : i32
    %c0_i32_1 = arith.constant 0 : i32
    return %c0_i32, %c0_i32_0 : i32, i32
  }
  func.func @transform_3(%arg0: i32) -> (i32, i32, i32) {
    %c0_i32 = arith.constant 0 : i32
    %c0_i32_0 = arith.constant 0 : i32
    %c0_i32_1 = arith.constant 0 : i32
    return %arg0, %c0_i32, %c0_i32_0 : i32, i32, i32
  }
}

</mosaic_0001>

<bundles_post_ra>
// kernel: transformer_block_pallas.1
= control target key start
LH: loop header
LB: loop body
LE: loop exit
PB: predicated region body
PF: predicated region fallthrough
CT: control target
= control target key end

     0   :  { %8 = vsyncpa [#allocation3], 0  ;;  %s1833_s0 = inlined_call_operand.vmem [shape: f32[2,8,32], index: 0, kind: input, shape index: {}]   ;;  %s1834_s1 = inlined_call_operand.hbm [shape: f32[48,408], index: 1, kind: input, shape index: {}]   ;;  %s1835_s2 = inlined_call_operand.vmem [shape: f32[8,256], index: 2, kind: input, shape index: {}]   ;;  %s1836_s3 = inlined_call_operand.hbm [shape: f32[2,8,24], index: 3, kind: output, shape index: {}]  }
   0x1   :  { %9 = vsyncpa [#allocation4], 0 }
   0x2   :  { %11 = vsyncpa [#allocation4 + $0x1], 0  ;;  %s1605_s12 = smov 0   ;;  %s1607_s13 = smov 0  }
   0x3   :  { %s1609_s14 = smov 0   ;;  %s1611_s15 = smov 0  }
   0x4 LB: > { %s1626_s16 = sadd.s32 4294967295, %s1568_s15   ;;  %s1273_s17 = sadd.s32 4294967294, %s1568_s15   ;;  %s1568_s15 = sphi %s1611_s15, %s1844_s15   ;;  %s1564_s14 = sphi %s1609_s14, %s1843_s14   ;;  %s1560_s13 = sphi %s1607_s13, %s1842_s13   ;;  %s1556_s12 = sphi %s1605_s12, %s1841_s12  }
   0x5   : > { %s1630_s18 = sadd.s32 1, %s1568_s15   ;;  %s92_s19 = sadd.s32 1, %s1564_s14 }
   0x6   : > { %s89_s20 = ssub.s32 %s1568_s15, %s1630_s18  ;;  %p102_p0 = scmp.ne.s32.totalorder %s1564_s14, %s1560_s13 }
   0x7   : > { %p90_p1 = scmp.eq.s32.totalorder %s89_s20, 0  ;;  %p103_p2 = scmp.eq.s32.totalorder %s1626_s16, 1 }
   0x8   : > { %p108_p3 = scmp.ne.s32.totalorder %s1560_s13, %s1556_s12  ;;  %p109_p4 = scmp.eq.s32.totalorder %s1273_s17, 1 }
   0x9   : > { %s1641_s21 = scalar_select %p90_p1, %s1564_s14, %s92_s19  }
   0xa   : > { %p1643_p5 = por %p103_p2, %p102_p0  ;;  %p1647_p6 = por %p109_p4, %p108_p3 }
   0xb   : > { %p1274_p7 = scmp.ge.s32.totalorder %s1568_s15, 1  ;;  %p116_p8 = scmp.lt.s32.totalorder %s1568_s15, 3 }
   0xc   : > { %s1838_s23 = scalar_select %p1647_p6, 1, 0 }
   0xd   : > { %p1405_p9 = scmp.eq.s32.totalorder %s1626_s16, 0  ;;  %p1654_p10 = pnand %p1274_p7, %p116_p8 }
   0xe   : > { %s1570_s25 = smov [#allocation2]  }
   0xf   : > { %s128_s26 = sshll.u32 %s1570_s25, 4  ;;  %p1397_p11 = pneg %p1654_p10  ;;  %s129_s26 = int_to_ptr.vmem [resolvable:$true] %s128_s26 }
  0x10   : > { %s1489_s27 = scalar_lea.vmem %s129_s26, 3072  ;;  %p1497_p3 = scmp.lt.s32.totalorder %s129_s26, %s129_s26 }
  0x11   : > { %p1398_p12 = pnand %p1405_p9, %p1397_p11  ;;  %p1490_p0 = scmp.ne.s32.totalorder %s129_s26, %s1489_s27 }
  0x12   : > { %p1498_p4 = scmp.lt.s32.totalorder %s1489_s27, %s1489_s27 }
  0x13   : > { %p1480_p13 = pneg %p1398_p12 }
  0x14   : > { %p1499_p6 = por %p1498_p4, %p1497_p3 }
  0x15   : > { %p1492_p1 = pnand %p1490_p0, %p1480_p13 }
  0x17   : > { %p1493_p2 = pneg %p1492_p1 }
  0x19   : > { %p1500_p7 = pnand %p1499_p6, %p1493_p2 }
  0x1b   : > { %1503 = shalt.err (!%p1500_p7)
}
  0x1c   : > { %s1571_s28 = smov 512   ;;  %s1572_s29 = smov 32  }
  0x1d   : > { %1400 = dma.hbm_to_vmem [thread:$0]  (!%p1398_p12), %s1834_s1, 3072, %s129_s26, [#allocation3], %s1571_s28, %s1571_s28, %s1572_s29  }
  0x1e   : > { %154 = sbr.rel (%p1654_p10) target bundleno = 2353 (0x931), region = 32 }
  0x23   : > { %1547 = dma.done.wait (%p1405_p9), [#allocation3], 3072  }
  0x24   : > { %1549 = vsyncadd (%p1405_p9), [#allocation3], 4294964224  ;;  %p177_p8 = scmp.lt.s32.totalorder %s1626_s16, 1  ;;  %vm190_vm0 = vcmask 195584   ;;  %v215_v7 = vld [vmem:[#allocation2 + $0x68] sm:$0xff]  ;;  %v214_v8 = vld [vmem:[#allocation2 + $0x60] sm:$0xff]  ;;  %v217_v29 = vlaneseq }
  0x25   : > { %v213_v9 = vld [vmem:[#allocation2 + $0x48] sm:$0xff]  ;;  %255 = vmatprep.subr.mxu0 %v215_v7  ;;  %v212_v10 = vld [vmem:[#allocation2 + $0x40] sm:$0xff]  ;;  %v1573_v11 = vmov 0.0   ;;  %v1574_v16 = vmov 25   ;;  %v1575_v17 = vmov 24   ;;  %v1576_v18 = vmov 26  }
  0x26   : > { %s178_s5 = scalar_select %p177_p8, %s1626_s16, 1  ;;  %295 = vmatprep.mubr.f32.mxu0 %v1573_v11  ;;  %256 = vmatpush1.msra.mxu0 %v214_v8  ;;  %v211_v12 = vld [vmem:[#allocation2 + $0x28] sm:$0xff]  ;;  %v210_v13 = vld [vmem:[#allocation2 + $0x20] sm:$0xff]  ;;  %vm227_vm1 = vcmask 261120   ;;  %v218_v30 = vshrl.u32 %v217_v29, 7  ;;  %vm352_vm2 = vcmask 64512  }
  0x27   : > { %1332 = vmatprep.subr.mxu1 %v1573_v11  ;;  %257 = vmatprep.subr.mxu0 %v213_v9  ;;  %v209_v14 = vld [vmem:[#allocation2 + $0x8] sm:$0xff]  ;;  %v208_v15 = vld [vmem:[#allocation2] sm:$0xff]  ;;  %s1577_s25 = smov 96   ;;  %s1578_s26 = smov 64   ;;  %vm1581_vm3 = vmmov 0   ;;  %vm1097_vm4 = vcmask 392192  }
  0x28   : > { %s1280_s6 = sshll.u32 %s178_s5, 3  ;;  %258 = vmatpush1.msra.mxu0 %v212_v10  ;;  %1454 = vset.pattern.permute.xlu1 %v1574_v16  ;;  %v183_v23 = vld [vmem:[%s1835_s2 + $0x1] ss:$0 sm:$0xff]  ;;  %v184_v25 = vld [vmem:[%s1835_s2 + $0x2] ss:$0 sm:$0xff]  ;;  %v219_v31 = vsub.s32 0, %v218_v30 }
  0x29   : > { %s180_s9 = scalar_lea.vmem %s1833_s0, %s1280_s6  ;;  %259 = vmatprep.subr.mxu0 %v211_v12  ;;  %1456 = vset.pattern.permute.xlu0 %v1575_v17  ;;  %v182_v32 = vld [vmem:[%s1835_s2] ss:$8 sm:$0x3]  ;;  %v223_v33 = vsub.s32 1, %v218_v30  ;;  %s1579_s27 = smov 120  }
  0x2a   : > { %v181_v0 = vld [vmem:[%s180_s9] sm:$0xff]  ;;  %260 = vmatpush1.msra.mxu0 %v210_v13  ;;  %v220_v34 = vrot.slane %v182_v32, %v219_v31  ;;  %s1580_s28 = smov 112   ;;  %1334 = vmatprep.mubr.msk.f32.mxu1 %vm1581_vm3, %v1573_v11  ;;  %s1582_s29 = smov 104  }
  0x2b   : > { %v191_v1 = vsel %vm190_vm0, %v181_v0, 0.0  ;;  %261 = vmatprep.subr.mxu0 %v209_v14  ;;  %310 = vperm.xlu1 %1454, %v181_v0   ;;  %v224_v35 = vrot.slane %v182_v32, %v223_v33  ;;  %s1583_s30 = smov 32   ;;  %s174_s10 = sand.u32 1, %s1560_s13  }
  0x2c   : > { %192 = vadd.xlane.f32.xlu0 %v191_v1  ;;  %262 = vmatpush1.msra.mxu0 %v208_v15  ;;  %s1279_s11 = sshll.u32 %s174_s10, 3  ;;  %s1189_s4 = scalar_lea.sflag [#allocation4], %s174_s10 }
  0x2d   : > { %1327 = vmatprep.subr.mxu0 %v1573_v11  ;;  %s1584_s6 = smov [#allocation5]  }
  0x2e   : > { %s1508_s7 = sshll.u32 %s1584_s6, 4  ;;  %s1509_s7 = int_to_ptr.vmem [resolvable:$false] %s1508_s7 }
  0x2f   : > { %1455 = vset.pattern.permute.xlu1 %v1576_v18 }
  0x30   : > { %320 = vperm.xlu1 %1455, %v181_v0  }
  0xa6   : > { %v311_v36 = vpop.permute.xlu1 %310 }
  0xab   : > { %v321_v42 = vpop.permute.xlu1 %320 }
  0xb5   : > { %v193_v2 = vpop.xlane.xlu0 %192 }
  0xb6   : > { %v195_v3 = vmul.f32 0.041666668, %v193_v2 }
  0xb8   : > { %v196_v4 = vsub.f32 %v181_v0, %v195_v3 }
  0xba   : > { %v197_v5 = vmul.f32 %v196_v4, %v196_v4 }
  0xbc   : > { %v198_v6 = vsel %vm190_vm0, %v197_v5, 0.0 }
  0xbd   : > { %199 = vadd.xlane.f32.xlu0 %v198_v6 }
  0xd3   : > { %304 = vperm.xlu0 %1456, %v181_v0  }
  0xd7   : > { %1457 = vset.pattern.permute.xlu0 %v1576_v18 }
 0x146   : > { %v200_v19 = vpop.xlane.xlu0 %199 }
 0x147   : > { %v201_v20 = vmul.f32 0.041666668, %v200_v19 }
 0x149   : > { %v202_v21 = vadd.f32 1e-05, %v201_v20 }
 0x14b   : > { %1458 = vrsqrt.f32 %v202_v21 }
 0x14e   : > { %v305_v44 = vpop.permute.xlu0 %304 }
 0x158   : > { %v1459_v22 = vpop.eup %1458 }
 0x159   : > { %v204_v24 = vmul.f32 %v1459_v22, %v196_v4 }
 0x15b   : > { %v205_v26 = vmul.f32 %v204_v24, %v183_v23 }
 0x15d   : > { %v1687_v27 = vadd.f32 %v205_v26, %v184_v25 }
 0x15f   : > { %v207_v28 = vsel %vm190_vm0, %v1687_v27, %v181_v0 }
 0x160   : > { %1281 = vmatmul.mubr.msk.f32.vlgmr.msra.gmra.mxu0 %vm227_vm1, %v207_v28 }
 0x161   : > { %1329 = vmatprep.mubr.msk.f32.mxu0 %vm1581_vm3, %v1573_v11 }
 0x220   : > { %v297_v37 = vpop.f32.mrf.mxu0 }
 0x221   : > { %v1695_v38 = vadd.f32 %v297_v37, %v220_v34 }
 0x222   : > { %v299_v39 = vpop.f32.mrf.mxu0 }
 0x223   : > { %v1697_v40 = vadd.f32 %v299_v39, %v224_v35  ;;  %1328 = vmatpush3.xpose.msk.msra.mxu0 %vm352_vm2, %v1695_v38 }
 0x224   : > { %1337 = vmatprep.subr.mxu0 %v1573_v11 }
 0x225   : > { %v313_v41 = vmul.f32 %v311_v36, %v1697_v40  ;;  %v323_v43 = vmul.f32 %v321_v42, %v1697_v40  ;;  %v307_v46 = vmul.f32 %v305_v44, %v1697_v40 }
 0x227   : > { %315 = vrot.lane.b32.xlu1 %v313_v41, %s1577_s25 }
 0x22b   : > { %325 = vrot.lane.b32.xlu1 %v323_v43, %s1578_s26 }
 0x299   : > { %v316_v45 = vpop.permute.xlu1 %315 }
 0x29a   : > { %v318_v47 = vadd.f32 %v316_v45, %v307_v46 }
 0x29d   : > { %v326_v48 = vpop.permute.xlu1 %325 }
 0x29e   : > { %v328_v49 = vadd.f32 %v326_v48, %v318_v47 }
 0x2a0   : > { %330 = vrot.lane.b32.xlu1 %v328_v49, %s1579_s27 }
 0x2a4   : > { %332 = vrot.lane.b32.xlu1 %v328_v49, %s1580_s28 }
 0x2a8   : > { %334 = vrot.lane.b32.xlu1 %v328_v49, %s1582_s29 }
 0x2ac   : > { %337 = vrot.lane.b32.xlu1 %v1695_v38, %s1579_s27 }
 0x2b0   : > { %339 = vrot.lane.b32.xlu1 %v1695_v38, %s1580_s28 }
 0x2b4   : > { %341 = vrot.lane.b32.xlu1 %v1695_v38, %s1582_s29 }
 0x2b8   : > { %350 = vrot.lane.b32.xlu1 %v328_v49, %s1577_s25 }
 0x312   : > { %v331_v50 = vpop.permute.xlu1 %330 }
 0x313   : > { %427 = vrot.lane.b32.xlu1 %v331_v50, %s1577_s25 }
 0x316   : > { %v333_v51 = vpop.permute.xlu1 %332 }
 0x317   : > { %503 = vrot.lane.b32.xlu1 %v333_v51, %s1577_s25 }
 0x31a   : > { %v335_v52 = vpop.permute.xlu1 %334 }
 0x31b   : > { %579 = vrot.lane.b32.xlu0 %v335_v52, %s1577_s25  ;;  %v1016_v52 = vld [vmem:[#allocation2 + $0x50] sm:$0xff] }
 0x31e   : > { %v338_v53 = vpop.permute.xlu1 %337 }
 0x31f   : > { %1333 = vmatpush3.xpose.msk.msra.mxu1 %vm352_vm2, %v338_v53  ;;  %v1015_v53 = vld [vmem:[#allocation2 + $0x30] sm:$0xff] }
 0x320   : > { %1342 = vmatprep.subr.mxu1 %v1573_v11 }
 0x322   : > { %v340_v54 = vpop.permute.xlu1 %339 }
 0x326   : > { %v342_v55 = vpop.permute.xlu1 %341 }
 0x32a   : > { %v351_v56 = vpop.permute.xlu1 %350 }
 0x32b   : > { %1330 = vmatmul.mubr.msk.f32.vlgmr.msra.gmra.mxu0 %vm352_vm2, %v351_v56  ;;  %v1022_v56 = vld [vmem:[#allocation2 + $0xb8] sm:$0xff] }
 0x32c   : > { %1338 = vmatpush3.xpose.msk.msra.mxu0 %vm352_vm2, %v340_v54  ;;  %1339 = vmatprep.mubr.msk.f32.mxu0 %vm1581_vm3, %v1573_v11  ;;  %v1014_v54 = vld [vmem:[#allocation2 + $0x10] sm:$0xff] }
 0x32d   : > { %1347 = vmatprep.subr.mxu0 %v1573_v11 }
 0x385   : > { %v428_v57 = vpop.permute.xlu1 %427 }
 0x386   : > { %1335 = vmatmul.mubr.msk.f32.vlgmr.msra.gmra.mxu1 %vm352_vm2, %v428_v57  ;;  %v1021_v57 = vld [vmem:[#allocation2 + $0x98] sm:$0xff] }
 0x387   : > { %1343 = vmatpush3.xpose.msk.msra.mxu1 %vm352_vm2, %v342_v55  ;;  %1344 = vmatprep.mubr.msk.f32.mxu1 %vm1581_vm3, %v1573_v11 }
 0x388   : > { %1352 = vmatprep.subr.mxu1 %v1573_v11 }
 0x389   : > { %v504_v58 = vpop.permute.xlu1 %503 }
 0x38a   : > { %1340 = vmatmul.mubr.msk.f32.vlgmr.msra.gmra.mxu0 %vm352_vm2, %v504_v58 }
 0x38b   : > { %1349 = vmatprep.mubr.msk.f32.mxu0 %vm1581_vm3, %v1573_v11 }
 0x38d   : > { %v580_v59 = vpop.permute.xlu0 %579 }
 0x38e   : > { %1345 = vmatmul.mubr.msk.f32.vlgmr.msra.gmra.mxu1 %vm352_vm2, %v580_v59  ;;  %v1020_v59 = vld [vmem:[#allocation2 + $0x78] sm:$0xff] }
 0x38f   : > { %1354 = vmatprep.mubr.msk.f32.mxu1 %vm1581_vm3, %v1573_v11 }
 0x3eb   : > { %v423_v60 = vpop.f32.mrf.mxu0 }
 0x3ec   : > { %v655_v61 = vmul.f32 0.35355338, %v423_v60 }
 0x3ed   : > { %v1331_v62 = vpop.f32.mrf.mxu0 }
 0x3ee   : > { %v659_v63 = vsel %vm352_vm2, %v655_v61, -inf }
 0x3ef   : > { %660 = vmax.xlane.f32.xlu1 %v659_v63 }
 0x446   : > { %v499_v0 = vpop.f32.mrf.mxu1 }
 0x447   : > { %v656_v1 = vmul.f32 0.35355338, %v499_v0 }
 0x448   : > { %v1336_v2 = vpop.f32.mrf.mxu1 }
 0x449   : > { %v662_v3 = vsel %vm352_vm2, %v656_v1, -inf }
 0x44a   : > { %663 = vmax.xlane.f32.xlu0 %v662_v3  ;;  %v575_v4 = vpop.f32.mrf.mxu0 }
 0x44b   : > { %v657_v5 = vmul.f32 0.35355338, %v575_v4 }
 0x44c   : > { %v1341_v6 = vpop.f32.mrf.mxu0 }
 0x44d   : > { %v665_v7 = vsel %vm352_vm2, %v657_v5, -inf  ;;  %v185_v6 = vld [vmem:[%s1835_s2 + $0x3] ss:$0 sm:$0xff] }
 0x44e   : > { %v651_v8 = vpop.f32.mrf.mxu1  ;;  %666 = vmax.xlane.f32.xlu0 %v665_v7 }
 0x44f   : > { %v658_v9 = vmul.f32 0.35355338, %v651_v8 }
 0x450   : > { %v1346_v10 = vpop.f32.mrf.mxu1 }
 0x451   : > { %v668_v12 = vsel %vm352_vm2, %v658_v9, -inf }
 0x452   : > { %669 = vmax.xlane.f32.xlu1 %v668_v12 }
 0x463   : > { %345 = vrot.lane.b32.xlu1 %v1695_v38, %s1578_s26  ;;  %s176_s26 = scalar_lea.vmem [#allocation5], %s1279_s11 }
 0x464   : > { %343 = vrot.lane.b32.xlu0 %v1695_v38, %s1577_s25  ;;  %s1202_s27 = sshll.u32 %s176_s26, 4  ;;  %s1203_s27 = int_to_ptr.vmem [resolvable:$true] %s1202_s27 }
 0x465   : > { %s1504_s5 = scalar_lea.vmem %s1203_s27, 128  ;;  %p1511_p11 = scmp.lt.s32.totalorder %s1203_s27, %s1509_s7 }
 0x466   : > { %p1505_p6 = scmp.ne.s32.totalorder %s1203_s27, %s1504_s5 }
 0x467   : > { %348 = vrot.lane.b32.xlu1 %v1697_v40, %s1583_s30 }
 0x468   : > { %p1506_p9 = pnand %p1505_p6, %p1643_p5 }
 0x46a   : > { %p1507_p10 = pneg %p1506_p9 }
 0x478   : > { %v661_v13 = vpop.xlane.xlu1 %660 }
 0x479   : > { %v671_v14 = vsub.f32 %v655_v61, %v661_v13  ;;  %v1019_v13 = vld [vmem:[#allocation2 + $0x58] sm:$0xff] }
 0x47b   : > { %v675_v15 = vmul.f32 1.442695, %v671_v14  ;;  %v1018_v14 = vld [vmem:[#allocation2 + $0x38] sm:$0xff] }
 0x47d   : > { %1460 = vpow2.f32 %v675_v15  ;;  %v1017_v15 = vld [vmem:[#allocation2 + $0x18] sm:$0xff] }
 0x48a   : > { %v1461_v16 = vpop.eup %1460 }
 0x48b   : > { %v683_v17 = vsel %vm352_vm2, %v1461_v16, 0.0 }
 0x48c   : > { %684 = vadd.xlane.f32.xlu0 %v683_v17 }
 0x4d3   : > { %v664_v18 = vpop.xlane.xlu0 %663 }
 0x4d4   : > { %v672_v26 = vsub.f32 %v656_v1, %v664_v18 }
 0x4d6   : > { %v677_v30 = vmul.f32 1.442695, %v672_v26 }
 0x4d7   : > { %v667_v19 = vpop.xlane.xlu0 %666 }
 0x4d8   : > { %v673_v20 = vsub.f32 %v657_v5, %v667_v19 }
 0x4da   : > { %v679_v21 = vmul.f32 1.442695, %v673_v20  ;;  %v187_v20 = vld [vmem:[%s1835_s2 + $0x5] ss:$0 sm:$0xff] }
 0x4db   : > { %v344_v22 = vpop.permute.xlu0 %343  ;;  %v670_v23 = vpop.xlane.xlu1 %669 }
 0x4dc   : > { %1462 = vpow2.f32 %v679_v21  ;;  %v674_v24 = vsub.f32 %v658_v9, %v670_v23  ;;  %1348 = vmatpush3.msra.mxu0 %v344_v22  ;;  %777 = vrot.lane.b32.xlu1 %v344_v22, %s1577_s25 }
 0x4dd   : > { %1357 = vmatprep.subr.mxu0 %v1573_v11 }
 0x4de   : > { %v681_v25 = vmul.f32 1.442695, %v674_v24 }
 0x4df   : > { %v346_v35 = vpop.permute.xlu1 %345 }
 0x4e0   : > { %1464 = vpow2.f32 %v681_v25 }
 0x4e1   : > { %1466 = vpow2.f32 %v677_v30 }
 0x4e3   : > { %v349_v36 = vpop.permute.xlu1 %348 }
 0x4e9   : > { %v1463_v28 = vpop.eup %1462 }
 0x4ea   : > { %v689_v29 = vsel %vm352_vm2, %v1463_v28, 0.0 }
 0x4eb   : > { %690 = vadd.xlane.f32.xlu0 %v689_v29 }
 0x4ed   : > { %v1465_v31 = vpop.eup %1464 }
 0x4ee   : > { %v692_v32 = vsel %vm352_vm2, %v1465_v31, 0.0  ;;  %v1467_v33 = vpop.eup %1466 }
 0x4ef   : > { %693 = vadd.xlane.f32.xlu0 %v692_v32  ;;  %v686_v34 = vsel %vm352_vm2, %v1467_v33, 0.0 }
 0x500   : > { %687 = vadd.xlane.f32.xlu1 %v686_v34 }
 0x505   : > { %853 = vrot.lane.b32.xlu0 %v346_v35, %s1577_s25  ;;  %v188_v35 = vld [vmem:[%s1835_s2 + $0x6] ss:$0 sm:$0xff] }
 0x511   : > { %929 = vrot.lane.b32.xlu1 %v349_v36, %s1577_s25  ;;  %s1297_s25 = sshll.u32 %s1626_s16, 7  ;;  %s1510_s16 = scalar_lea.vmem %s1509_s7, 256 }
 0x512   : > { %s1200_s30 = scalar_lea.hbm %s1836_s3, %s1297_s25  ;;  %p1512_p12 = scmp.lt.s32.totalorder %s1510_s16, %s1504_s5 }
 0x514   : > { %p1513_p13 = por %p1512_p12, %p1511_p11 }
 0x515   : > { %v685_v37 = vpop.xlane.xlu0 %684 }
 0x516   : > { %1468 = vrcp.f32 %v685_v37  ;;  %v189_v37 = vld [vmem:[%s1835_s2 + $0x7] ss:$0 sm:$0xff]  ;;  %p1514_p0 = pnand %p1513_p13, %p1507_p10 }
 0x523   : > { %v1469_v38 = vpop.eup %1468 }
 0x524   : > { %v696_v39 = vmul.f32 %v1469_v38, %v1461_v16  ;;  %v186_v16 = vld [vmem:[%s1835_s2 + $0x4] ss:$0 sm:$0xff] }
 0x526   : > { %1350 = vmatmul.mubr.msk.f32.vlgmr.msra.gmra.mxu0 %vm352_vm2, %v696_v39 }
 0x527   : > { %1359 = vmatprep.mubr.msk.f32.mxu0 %vm1581_vm3, %v1573_v11 }
 0x54e   : > { %v778_v40 = vpop.permute.xlu1 %777 }
 0x54f   : > { %1353 = vmatpush3.msra.mxu1 %v778_v40 }
 0x550   : > { %1362 = vmatprep.subr.mxu1 %v1573_v11 }
 0x574   : > { %v691_v41 = vpop.xlane.xlu0 %690 }
 0x575   : > { %1470 = vrcp.f32 %v691_v41 }
 0x578   : > { %v694_v42 = vpop.xlane.xlu0 %693 }
 0x57c   : > { %v854_v43 = vpop.permute.xlu0 %853 }
 0x57d   : > { %1358 = vmatpush3.msra.mxu0 %v854_v43 }
 0x57e   : > { %1367 = vmatprep.subr.mxu0 %v1573_v11 }
 0x582   : > { %v1471_v44 = vpop.eup %1470 }
 0x583   : > { %v700_v45 = vmul.f32 %v1471_v44, %v1463_v28 }
 0x585   : > { %1360 = vmatmul.mubr.msk.f32.vlgmr.msra.gmra.mxu0 %vm352_vm2, %v700_v45 }
 0x586   : > { %1373 = vmatprep.mubr.msk.f32.mxu0 %vm1581_vm3, %v1573_v11  ;;  %1368 = vmatpush3.msra.mxu0 %v1016_v52 }
 0x587   : > { %1369 = vmatprep.subr.mxu0 %v1573_v11 }
 0x588   : > { %1370 = vmatpush3.msra.mxu0 %v1015_v53 }
 0x589   : > { %v688_v46 = vpop.xlane.xlu1 %687  ;;  %1371 = vmatprep.subr.mxu0 %v1573_v11 }
 0x58a   : > { %1472 = vrcp.f32 %v688_v46  ;;  %1372 = vmatpush3.msra.mxu0 %v1014_v54 }
 0x58b   : > { %1474 = vrcp.f32 %v694_v42 }
 0x58d   : > { %v930_v50 = vpop.permute.xlu1 %929 }
 0x597   : > { %v1473_v47 = vpop.eup %1472 }
 0x598   : > { %v698_v48 = vmul.f32 %v1473_v47, %v1467_v33  ;;  %v1475_v49 = vpop.eup %1474 }
 0x599   : > { %v702_v51 = vmul.f32 %v1475_v49, %v1465_v31 }
 0x59a   : > { %1355 = vmatmul.mubr.msk.f32.vlgmr.msra.gmra.mxu1 %vm352_vm2, %v698_v48 }
 0x59b   : > { %1363 = vmatpush3.msra.mxu1 %v930_v50  ;;  %1364 = vmatprep.mubr.msk.f32.mxu1 %vm1581_vm3, %v1573_v11 }
 0x59c   : > { %1376 = vmatprep.subr.mxu1 %v1573_v11 }
 0x59e   : > { %1365 = vmatmul.mubr.msk.f32.vlgmr.msra.gmra.mxu1 %vm352_vm2, %v702_v51 }
 0x59f   : > { %1388 = vmatprep.mubr.msk.f32.mxu1 %vm1581_vm3, %v1573_v11  ;;  %1377 = vmatpush3.msra.mxu1 %v1022_v56 }
 0x5a0   : > { %1378 = vmatprep.subr.mxu1 %v1573_v11 }
 0x5a1   : > { %1379 = vmatpush3.msra.mxu1 %v1021_v57 }
 0x5a2   : > { %1380 = vmatprep.subr.mxu1 %v1573_v11 }
 0x5a3   : > { %1381 = vmatpush3.msra.mxu1 %v1020_v59 }
 0x5a4   : > { %1382 = vmatprep.subr.mxu1 %v1573_v11 }
 0x5a5   : > { %1383 = vmatpush3.msra.mxu1 %v1019_v13 }
 0x5a6   : > { %1384 = vmatprep.subr.mxu1 %v1573_v11 }
 0x5a7   : > { %1385 = vmatpush3.msra.mxu1 %v1018_v14 }
 0x5a8   : > { %1386 = vmatprep.subr.mxu1 %v1573_v11 }
 0x5a9   : > { %1387 = vmatpush3.msra.mxu1 %v1017_v15 }
 0x5e6   : > { %v773_v55 = vpop.f32.mrf.mxu0 }
 0x5e7   : > { %v1005_v63 = vsel %vm227_vm1, %v773_v55, 0.0 }
 0x5e8   : > { %v1351_v58 = vpop.f32.mrf.mxu0 }
 0x645   : > { %v925_v60 = vpop.f32.mrf.mxu0 }
 0x646   : > { %v1008_v3 = vsel %vm227_vm1, %v925_v60, 0.0 }
 0x647   : > { %v1361_v61 = vpop.f32.mrf.mxu0 }
 0x65a   : > { %v849_v62 = vpop.f32.mrf.mxu1 }
 0x65b   : > { %v1006_v0 = vsel %vm227_vm1, %v849_v62, 0.0 }
 0x65c   : > { %v1007_v1 = vadd.f32 %v1006_v0, %v1005_v63  ;;  %v1356_v2 = vpop.f32.mrf.mxu1 }
 0x65e   : > { %v1001_v4 = vpop.f32.mrf.mxu1  ;;  %v1009_v5 = vadd.f32 %v1008_v3, %v1007_v1 }
 0x65f   : > { %v1010_v7 = vsel %vm227_vm1, %v1001_v4, 0.0 }
 0x660   : > { %v1011_v8 = vadd.f32 %v1010_v7, %v1009_v5  ;;  %v1366_v9 = vpop.f32.mrf.mxu1 }
 0x662   : > { %v1012_v10 = vadd.f32 %v1011_v8, %v185_v6 }
 0x664   : > { %v1013_v12 = vadd.f32 %v1012_v10, %v1687_v27 }
 0x666   : > { %1374 = vmatmul.mubr.msk.f32.vlgmr.msra.gmra.mxu0 %vm190_vm0, %v1013_v12 }
 0x726   : > { %v1092_v17 = vpop.f32.mrf.mxu0 }
 0x727   : > { %v1093_v18 = vadd.f32 %v1092_v17, %v186_v16 }
 0x728   : > { %v1375_v19 = vpop.f32.mrf.mxu0 }
 0x729   : > { %v1096_v27 = vmax.f32 %v1093_v18, 0.0 }
 0x72b   : > { %1389 = vmatmul.mubr.msk.f32.vlgmr.msra.gmra.mxu1 %vm1097_vm4, %v1096_v27 }
 0x7eb   : > { %v1167_v21 = vpop.f32.mrf.mxu1 }
 0x7ec   : > { %v1168_v22 = vadd.f32 %v1167_v21, %v187_v20 }
 0x7ed   : > { %v1390_v23 = vpop.f32.mrf.mxu1 }
 0x7ee   : > { %v1171_v11 = vadd.f32 %v1168_v22, %v1013_v12 }
 0x7f0   : > { %v1172_v24 = vsel %vm190_vm0, %v1171_v11, 0.0 }
 0x7f1   : > { %1173 = vadd.xlane.f32.xlu1 %v1172_v24 }
 0x87a   : > { %v1174_v25 = vpop.xlane.xlu1 %1173 }
 0x87b   : > { %v1175_v26 = vmul.f32 0.041666668, %v1174_v25 }
 0x87d   : > { %v1176_v28 = vsub.f32 %v1171_v11, %v1175_v26 }
 0x87f   : > { %v1177_v29 = vmul.f32 %v1176_v28, %v1176_v28 }
 0x881   : > { %v1178_v30 = vsel %vm190_vm0, %v1177_v29, 0.0 }
 0x882   : > { %1179 = vadd.xlane.f32.xlu0 %v1178_v30 }
 0x90b   : > { %v1180_v31 = vpop.xlane.xlu0 %1179 }
 0x90c   : > { %v1181_v32 = vmul.f32 0.041666668, %v1180_v31 }
 0x90e   : > { %v1182_v33 = vadd.f32 1e-05, %v1181_v32 }
 0x910   : > { %1476 = vrsqrt.f32 %v1182_v33 }
 0x91d   : > { %v1477_v34 = vpop.eup %1476 }
 0x91e   : > { %v1184_v36 = vmul.f32 %v1477_v34, %v1176_v28 }
 0x920   : > { %v1185_v38 = vmul.f32 %v1184_v36, %v188_v35 }
 0x922   : > { %v1186_v39 = vadd.f32 %v1185_v38, %v189_v37 }
 0x924   : > { %1187 = vst.msk [vmem:[%s176_s26] sm:$0xff] %vm190_vm0, %v1186_v39 }
 0x925   : > { %1517 = shalt.err (!%p1514_p0)
}
 0x926   : > { %s1518_s8 = scalar_lea.hbm %s1200_s30, 128  ;;  %s1522_s11 = scalar_lea.hbm %s1836_s3, 256 }
 0x927   : > { %p1519_p1 = scmp.ne.s32.totalorder %s1200_s30, %s1518_s8  ;;  %p1523_p4 = scmp.lt.s32.totalorder %s1200_s30, %s1836_s3 }
 0x928   : > { %p1524_p7 = scmp.lt.s32.totalorder %s1522_s11, %s1518_s8 }
 0x929   : > { %p1520_p2 = pnand %p1519_p1, %p1643_p5 }
 0x92a   : > { %p1525_p8 = por %p1524_p7, %p1523_p4 }
 0x92b   : > { %p1521_p3 = pneg %p1520_p2 }
 0x92d   : > { %p1526_p6 = pnand %p1525_p8, %p1521_p3 }
 0x92f   : > { %1529 = shalt.err (!%p1526_p6)
}
 0x930   : > { %1395 = dma.vmem_to_hbm [thread:$0]  (%p1643_p5), %s1203_s27, 128, %s1200_s30, %s1189_s4  }
 0x931 PF: > { %p1407_p9 = scmp.ge.s32.totalorder %s1568_s15, 2  ;;  %s1214_s20 = sand.u32 1, %s1556_s12  }
 0x932   : > { %p1840_p10 = scmp.ne.s32.totalorder %s1838_s23, 0  ;;  %s1215_s24 = scalar_lea.sflag [#allocation4], %s1214_s20 }
 0x934   : > { %p1402_p11 = pnand %p1407_p9, %p1840_p10 }
 0x936   : > { %p1403_p12 = pneg %p1402_p11 }
 0x938   : > { %1551 = dma.done.wait (%p1403_p12), %s1215_s24, 128  }
 0x939   : > { %1553 = vsyncadd (%p1403_p12), %s1215_s24, 4294967168  ;;  %p14_p13 = scmp.ge.s32.totalorder %s1630_s18, 4   ;;  %s1841_s12 = smov %s1560_s13 }
 0x93a   : > { %s1842_s13 = smov %s1564_s14  ;;  %s1843_s14 = smov %s1641_s21 }
 0x93b   : > { %s1844_s15 = smov %s1630_s18  ;;  %16 = sbr.rel (!%p14_p13) target bundleno = 4 (0x4), region = 72 }
 0x940   :  { %1220 = vsyncpa [#allocation3], 1 }
 0x941   :  { %1222 = vsyncpa [#allocation3 + $0x1], 1 }
 0x942   :  { %1223 = vsyncpa [#allocation4], 1 }
 0x943   :  { %1225 = vsyncpa [#allocation4 + $0x1], 1 }

</bundles_post_ra>
